<compile_context>
chip_gen: v7x
topology: tpu7x:2x2x1
jax: 0.10.0
libtpu: 0.0.40
codegen_flags: <defaults>
</compile_context>

<pallas_src>
import functools

import jax
import jax.numpy as jnp
import numpy as np
from jax.experimental import pallas as pl
from jax.experimental.pallas import tpu as pltpu

_LANE = 128
_SUBLANE = 8
# ~4 MiB of input per pipeline buffer per input (2 inputs x 2 buffers = 16 MiB
# of double-buffered input VMEM at the default), plus headroom for compiler
# temporaries inside the raised scoped-VMEM limit below.
_DEFAULT_TILE_BYTES = 4 * 1024 * 1024
_VMEM_LIMIT_BYTES = 48 * 1024 * 1024


def _bce(x, t, logits):
    """Elementwise BCE in f32, matching PyTorch semantics."""
    if logits:
        # F.binary_cross_entropy_with_logits (numerically stable form).
        return jnp.maximum(x, 0.0) - x * t + jnp.log1p(jnp.exp(-jnp.abs(x)))
    # F.binary_cross_entropy: PyTorch clamps each log term at -100.
    log_x = jnp.maximum(jnp.log(x), -100.0)
    log_1mx = jnp.maximum(jnp.log(1.0 - x), -100.0)
    return -(t * log_x + (1.0 - t) * log_1mx)


def _bce_partial_kernel(x_ref, t_ref, out_ref, *, tile_rows, logits, ragged,
                        valid_rows_last):
    """Per-block elementwise BCE, reduced to an (8, 128) partial sum."""
    x = x_ref[...].astype(jnp.float32)
    t = t_ref[...].astype(jnp.float32)
    bce = _bce(x, t, logits)

    if tile_rows % _SUBLANE == 0:
        def _partial(v):
            # (tile_rows,128) -> (tile_rows/8, 8, 128) -> sum over the leading
            # axis: vreg-aligned VPU adds only, no cross-lane XLU work.
            return jnp.sum(v.reshape(tile_rows // _SUBLANE, _SUBLANE, _LANE),
                           axis=0)

        out_ref[...] = _partial(bce)

        if ragged:
            # Only the LAST grid block is row-ragged: all steady-state blocks
            # run unmasked, and the masked reduce is redone for this single
            # block against a compile-time constant threshold (reuses the
            # already-computed bce; OOB garbage is removed by the select).
            @pl.when(pl.program_id(0) == pl.num_programs(0) - 1)
            def _():
                row = jax.lax.broadcasted_iota(jnp.int32, (tile_rows, _LANE), 0)
                out_ref[...] = _partial(
                    jnp.where(row < valid_rows_last, bce, 0.0))
    else:
        # Single small block (tile_rows == total rows, not a multiple of 8):
        # one cross-sublane reduce, parked in sublane 0 of the (8,128) slab.
        row = jax.lax.broadcasted_iota(jnp.int32, (_SUBLANE, _LANE), 0)
        out_ref[...] = jnp.where(row == 0,
                                 jnp.sum(bce, axis=0, keepdims=True), 0.0)


def focal_loss(inputs, targets, *, alpha=1.0, gamma=2.0, logits=False,
               reduce=True, tile_bytes=_DEFAULT_TILE_BYTES):
    """Pallas implementation of FocalLoss.forward (returns a scalar)."""
    del reduce  # torch.mean of a scalar is a no-op; both branches agree.
    n = int(np.prod(inputs.shape))
    flat_x = jnp.ravel(inputs)      # native dtype; cast to f32 inside the kernel
    flat_t = jnp.ravel(targets)

    n_main = (n // _LANE) * _LANE   # lane-aligned prefix handled by the kernel
    tail = n - n_main               # <128 ragged elements handled in plain JAX

    total = jnp.float32(0.0)
    if n_main > 0:
        rows = n_main // _LANE
        x_main = flat_x[:n_main] if tail else flat_x
        t_main = flat_t[:n_main] if tail else flat_t
        x2 = x_main.reshape(rows, _LANE)
        t2 = t_main.reshape(rows, _LANE)

        itemsizes = (jnp.dtype(inputs.dtype).itemsize,
                     jnp.dtype(targets.dtype).itemsize)
        # Packed-sublane minimum for the narrowest streamed dtype:
        # 8 (f32), 16 (bf16/f16), 32 (int8/fp8).
        sub_mult = _SUBLANE * max(1, 4 // min(itemsizes))
        # Rows per block sized so the widest input uses ~tile_bytes per
        # pipeline buffer; rounded to the packed-sublane multiple.
        target_rows = max(int(tile_bytes) // (_LANE * max(itemsizes)), sub_mult)
        target_rows = max((target_rows // sub_mult) * sub_mult, sub_mult)

        if rows <= target_rows:
            tr = rows               # single block == full dim (always legal)
        else:
            tr = target_rows
        num_blocks = (rows + tr - 1) // tr
        valid_rows_last = rows - (num_blocks - 1) * tr
        ragged = valid_rows_last != tr

        kernel = functools.partial(
            _bce_partial_kernel, tile_rows=tr, logits=logits, ragged=ragged,
            valid_rows_last=valid_rows_last)

        partials = pl.pallas_call(
            kernel,
            out_shape=jax.ShapeDtypeStruct((num_blocks * _SUBLANE, _LANE),
                                           jnp.float32),
            grid_spec=pltpu.PrefetchScalarGridSpec(
                num_scalar_prefetch=0,
                grid=(num_blocks,),
                in_specs=[
                    pl.BlockSpec((tr, _LANE), lambda i: (i, 0)),
                    pl.BlockSpec((tr, _LANE), lambda i: (i, 0)),
                ],
                # Lane-dense (8,128) partial-sum slab per grid step; no block
                # is revisited, so the axis can be "parallel" (v7x megacore).
                out_specs=pl.BlockSpec((_SUBLANE, _LANE), lambda i: (i, 0)),
            ),
            compiler_params=pltpu.CompilerParams(
                dimension_semantics=("parallel",),
                vmem_limit_bytes=_VMEM_LIMIT_BYTES,
            ),
        )(x2, t2)
        total = total + jnp.sum(partials)

    if tail > 0:
        # <=127 trailing elements: negligible traffic, done in plain JAX so no
        # whole-array jnp.pad is ever materialized for non-128-aligned sizes.
        tx = flat_x[n_main:].astype(jnp.float32)
        tt = flat_t[n_main:].astype(jnp.float32)
        total = total + jnp.sum(_bce(tx, tt, logits))

    mean_bce = total / jnp.float32(n)
    pt = jnp.exp(-mean_bce)
    return jnp.float32(alpha) * (1.0 - pt) ** jnp.float32(gamma) * mean_bce


def _focal_loss_ref(inputs, targets, *, alpha=1.0, gamma=2.0, logits=False):
    x = inputs.astype(jnp.float32)
    t = targets.astype(jnp.float32)
    mean_bce = jnp.mean(_bce(x, t, logits))
    pt = jnp.exp(-mean_bce)
    return alpha * (1.0 - pt) ** gamma * mean_bce


if __name__ == "__main__":
    key = jax.random.PRNGKey(0)
    k1, k2, k3, k4, k5, k6 = jax.random.split(key, 6)

    # 1) Primary: NCHW probabilities, lane-aligned count (2*4*16*16 = 2048).
    B, C, H, W = 2, 4, 16, 16
    probs = jax.random.uniform(k1, (B, C, H, W), jnp.float32,
                               minval=1e-4, maxval=1.0 - 1e-4)
    tgt = (jax.random.uniform(k2, (B, C, H, W)) > 0.5).astype(jnp.float32)
    out = jax.block_until_ready(
        focal_loss(probs, tgt, alpha=1.0, gamma=2.0, logits=False, reduce=True))
    ref = _focal_loss_ref(probs, tgt, alpha=1.0, gamma=2.0, logits=False)
    np.testing.assert_allclose(np.asarray(out), np.asarray(ref),
                               rtol=1e-5, atol=1e-6)

    # 2) Logits path + non-lane-aligned count (3*5*7*11 = 1155): kernel runs on
    #    the 1152-element prefix, the 3-element tail is reduced in plain JAX.
    logits_in = jax.random.normal(k3, (3, 5, 7, 11), jnp.float32)
    tgt2 = (jax.random.uniform(k4, (3, 5, 7, 11)) > 0.5).astype(jnp.float32)
    out2 = jax.block_until_ready(
        focal_loss(logits_in, tgt2, alpha=0.75, gamma=2.0, logits=True))
    ref2 = _focal_loss_ref(logits_in, tgt2, alpha=0.75, gamma=2.0, logits=True)
    np.testing.assert_allclose(np.asarray(out2), np.asarray(ref2),
                               rtol=1e-5, atol=1e-6)

    # 3) bf16 logits with forced-small tiles: exercises multi-block streaming,
    #    dtype-aware (16-row) sublane rounding, and the last-block pl.when mask
    #    (180 rows, 32-row blocks -> 6 blocks, 20 valid rows in the last one).
    shape3 = (1, 5, 36, 128)
    logits3 = jax.random.normal(k5, shape3, jnp.float32).astype(jnp.bfloat16)
    tgt3 = (jax.random.uniform(k6, shape3) > 0.5).astype(jnp.bfloat16)
    out3 = jax.block_until_ready(
        focal_loss(logits3, tgt3, alpha=0.5, gamma=2.0, logits=True,
                   tile_bytes=8 * 1024))
    ref3 = _focal_loss_ref(logits3, tgt3, alpha=0.5, gamma=2.0, logits=True)
    np.testing.assert_allclose(np.asarray(out3), np.asarray(ref3),
                               rtol=1e-4, atol=1e-6)

    print("KERNEL_OK")
</pallas_src>

<mosaic_0001>
module attributes {stable_mosaic.version = 11 : i64} {
  func.func @_bce_partial_kernel(%arg0: i32, %arg1: memref<16x128xf32, #tpu.memory_space<vmem>>, %arg2: memref<16x128xf32, #tpu.memory_space<vmem>>, %arg3: memref<8x128xf32, #tpu.memory_space<vmem>>) attributes {dimension_semantics = [#tpu.dimension_semantics<parallel>], iteration_bounds = array<i64: 1>, scalar_prefetch = 0 : i64, scratch_operands = 0 : i64, tpu.core_type = #tpu.core_type<tc>, window_params = [{transform_indices = @transform_0, window_bounds = array<i64: 16, 128>}, {transform_indices = @transform_1, window_bounds = array<i64: 16, 128>}, {transform_indices = @transform_2, window_bounds = array<i64: 8, 128>}]} {
    %c0 = arith.constant 0 : index
    %c0_0 = arith.constant 0 : index
    %0 = vector.load %arg1[%c0, %c0_0] : memref<16x128xf32, #tpu.memory_space<vmem>>, vector<16x128xf32>
    %c0_1 = arith.constant 0 : index
    %c0_2 = arith.constant 0 : index
    %1 = vector.load %arg2[%c0_1, %c0_2] : memref<16x128xf32, #tpu.memory_space<vmem>>, vector<16x128xf32>
    %2 = math.log %0 : vector<16x128xf32>
    %cst = arith.constant -1.000000e+02 : f32
    %3 = vector.broadcast %cst : f32 to vector<16x128xf32>
    %4 = arith.maximumf %2, %3 : vector<16x128xf32>
    %cst_3 = arith.constant 1.000000e+00 : f32
    %5 = vector.broadcast %cst_3 : f32 to vector<16x128xf32>
    %6 = arith.subf %5, %0 : vector<16x128xf32>
    %7 = math.log %6 : vector<16x128xf32>
    %cst_4 = arith.constant -1.000000e+02 : f32
    %8 = vector.broadcast %cst_4 : f32 to vector<16x128xf32>
    %9 = arith.maximumf %7, %8 : vector<16x128xf32>
    %10 = arith.mulf %1, %4 : vector<16x128xf32>
    %cst_5 = arith.constant 1.000000e+00 : f32
    %11 = vector.broadcast %cst_5 : f32 to vector<16x128xf32>
    %12 = arith.subf %11, %1 : vector<16x128xf32>
    %13 = arith.mulf %12, %9 : vector<16x128xf32>
    %14 = arith.addf %10, %13 : vector<16x128xf32>
    %cst_6 = arith.constant 0.000000e+00 : f32
    %15 = vector.broadcast %cst_6 : f32 to vector<16x128xf32>
    %16 = arith.subf %15, %14 : vector<16x128xf32>
    %17 = vector.shape_cast %16 : vector<16x128xf32> to vector<2x8x128xf32>
    %cst_7 = arith.constant dense<0.000000e+00> : vector<8x128xf32>
    %18 = vector.multi_reduction <add>, %17, %cst_7 [0] : vector<2x8x128xf32> to vector<8x128xf32>
    %c0_8 = arith.constant 0 : index
    %c0_9 = arith.constant 0 : index
    %19 = vector.load %arg3[%c0_8, %c0_9] : memref<8x128xf32, #tpu.memory_space<vmem>>, vector<8x128xf32>
    tpu.vector_store %arg3[%c0_8, %c0_9], %18 {strides = array<i32>} : memref<8x128xf32, #tpu.memory_space<vmem>>, vector<8x128xf32>,
    return
  }
  func.func @transform_0(%arg0: i32) -> (i32, i32) {
    %c0_i32 = arith.constant 0 : i32
    %c0_i32_0 = arith.constant 0 : i32
    return %arg0, %c0_i32 : i32, i32
  }
  func.func @transform_1(%arg0: i32) -> (i32, i32) {
    %c0_i32 = arith.constant 0 : i32
    %c0_i32_0 = arith.constant 0 : i32
    return %arg0, %c0_i32 : i32, i32
  }
  func.func @transform_2(%arg0: i32) -> (i32, i32) {
    %c0_i32 = arith.constant 0 : i32
    %c0_i32_0 = arith.constant 0 : i32
    return %arg0, %c0_i32 : i32, i32
  }
}

</mosaic_0001>

<bundles_post_ra>
// kernel: tpu_custom_call.1
= control target key start
LH: loop header
LB: loop body
LE: loop exit
PB: predicated region body
PF: predicated region fallthrough
CT: control target
= control target key end

     0   :  { %7 = vsyncpa [#allocation3], 0  ;;  %s227_s0 = inlined_call_operand.hbm [shape: f32[16,128], index: 0, kind: input, shape index: {}]   ;;  %s228_s1 = inlined_call_operand.hbm [shape: f32[16,128], index: 1, kind: input, shape index: {}]   ;;  %s229_s2 = inlined_call_operand.hbm [shape: f32[8,128], index: 2, kind: output, shape index: {}]  }
   0x1   :  { %8 = vsyncpa [#allocation6], 0 }
   0x2   :  { %9 = vsyncpa [#allocation4], 0  ;;  %s171_s9 = smov [#allocation2]   ;;  %s99_s13 = scalar_lea.hbm %s227_s0, 256 }
   0x3   :  { %s15_s10 = sshll.u32 %s171_s9, 4  ;;  %p100_p0 = scmp.ne.s32.totalorder %s227_s0, %s99_s13  ;;  %s16_s10 = int_to_ptr.vmem [resolvable:$true] %s15_s10 }
   0x4   :  { %p103_p1 = scmp.lt.u32.totalorder %s99_s13, %s227_s0 }
   0x6   :  { %p105_p2 = pnand %p103_p1, %p100_p0 }
   0x8   :  { %108 = shalt.err (!%p105_p2)
}
   0x9   :  { %s109_s18 = scalar_lea.vmem %s16_s10, 256  ;;  %p114_p4 = scmp.lt.s32.totalorder %s16_s10, %s16_s10 }
   0xa   :  { %p110_p3 = scmp.ne.s32.totalorder %s16_s10, %s109_s18  ;;  %p115_p5 = scmp.lt.s32.totalorder %s109_s18, %s109_s18 }
   0xc   :  { %p116_p6 = por %p115_p5, %p114_p4 }
   0xe   :  { %p117_p7 = pnand %p116_p6, %p110_p3 }
  0x10   :  { %120 = shalt.err (!%p117_p7)
}
  0x11   :  { %s172_s19 = smov 128   ;;  %s173_s20 = smov 8  }
  0x12   :  { %21 = dma.hbm_to_vmem [thread:$0]  %s227_s0, 256, %s16_s10, [#allocation3], %s172_s19, %s172_s19, %s173_s20  }
  0x13   :  { %s174_s23 = smov [#allocation5]   ;;  %s121_s27 = scalar_lea.hbm %s228_s1, 256 }
  0x14   :  { %s27_s24 = sshll.u32 %s174_s23, 4  ;;  %p122_p8 = scmp.ne.s32.totalorder %s228_s1, %s121_s27  ;;  %s28_s24 = int_to_ptr.vmem [resolvable:$true] %s27_s24 }
  0x15   :  { %p125_p9 = scmp.lt.u32.totalorder %s121_s27, %s228_s1 }
  0x17   :  { %p127_p10 = pnand %p125_p9, %p122_p8 }
  0x19   :  { %130 = shalt.err (!%p127_p10)
}
  0x1a   :  { %s131_s4 = scalar_lea.vmem %s28_s24, 256  ;;  %p136_p12 = scmp.lt.s32.totalorder %s28_s24, %s28_s24 }
  0x1b   :  { %p132_p11 = scmp.ne.s32.totalorder %s28_s24, %s131_s4  ;;  %p137_p13 = scmp.lt.s32.totalorder %s131_s4, %s131_s4 }
  0x1d   :  { %p138_p0 = por %p137_p13, %p136_p12 }
  0x1f   :  { %p139_p1 = pnand %p138_p0, %p132_p11 }
  0x21   :  { %142 = shalt.err (!%p139_p1)
}
  0x22   :  { %33 = dma.hbm_to_vmem [thread:$0]  %s228_s1, 256, %s28_s24, [#allocation6], %s172_s19, %s172_s19, %s173_s20  }
  0x23   :  { %165 = dma.done.wait [#allocation3], 256  }
  0x24   :  { %166 = vsyncadd [#allocation3], 4294967040 }
  0x25   :  { %167 = dma.done.wait [#allocation6], 256  }
  0x26   :  { %168 = vsyncadd [#allocation6], 4294967040  ;;  %v40_v0 = vld [vmem:[#allocation2] sm:$0xff]  ;;  %v41_v1 = vld [vmem:[#allocation2 + $0x8] sm:$0xff]  ;;  %s175_s1 = smov [#allocation7]  }
  0x27   :  { %91 = vlog2.f32 %v40_v0  ;;  %v50_v2 = vsub.f32 1.0, %v40_v0  ;;  %v51_v3 = vsub.f32 1.0, %v41_v1  ;;  %v42_v5 = vld [vmem:[#allocation5] sm:$0xff]  ;;  %v43_v7 = vld [vmem:[#allocation5 + $0x8] sm:$0xff]  ;;  %s76_s6 = sshll.u32 %s175_s1, 4  ;;  %s77_s6 = int_to_ptr.vmem [resolvable:$true] %s76_s6 }
  0x28   :  { %93 = vlog2.f32 %v41_v1  ;;  %v60_v14 = vsub.f32 1.0, %v42_v5  ;;  %v61_v17 = vsub.f32 1.0, %v43_v7  ;;  %s143_s7 = scalar_lea.vmem %s77_s6, 128  ;;  %p148_p3 = scmp.lt.s32.totalorder %s77_s6, %s77_s6 }
  0x29   :  { %95 = vlog2.f32 %v50_v2  ;;  %p144_p2 = scmp.ne.s32.totalorder %s77_s6, %s143_s7  ;;  %p149_p4 = scmp.lt.s32.totalorder %s143_s7, %s143_s7 }
  0x2a   :  { %97 = vlog2.f32 %v51_v3 }
  0x2b   :  { %p150_p5 = por %p149_p4, %p148_p3 }
  0x2d   :  { %p151_p6 = pnand %p150_p5, %p144_p2 }
  0x31   :  { %v92_v4 = vpop.eup %91 }
  0x32   :  { %v94_v6 = vpop.eup %93  ;;  %v45_v8 = vmul.f32 0.6931472, %v92_v4 }
  0x33   :  { %v96_v9 = vpop.eup %95  ;;  %v47_v10 = vmul.f32 0.6931472, %v94_v6 }
  0x34   :  { %v98_v11 = vpop.eup %97  ;;  %v48_v12 = vmax.f32 %v45_v8, -100.0  ;;  %v53_v13 = vmul.f32 0.6931472, %v96_v9 }
  0x35   :  { %v49_v15 = vmax.f32 %v47_v10, -100.0  ;;  %v55_v16 = vmul.f32 0.6931472, %v98_v11 }
  0x36   :  { %v56_v18 = vmax.f32 %v53_v13, -100.0  ;;  %v58_v19 = vmul.f32 %v48_v12, %v42_v5 }
  0x37   :  { %v57_v20 = vmax.f32 %v55_v16, -100.0  ;;  %v59_v21 = vmul.f32 %v49_v15, %v43_v7 }
  0x38   :  { %v62_v22 = vmul.f32 %v60_v14, %v56_v18 }
  0x39   :  { %v63_v23 = vmul.f32 %v61_v17, %v57_v20 }
  0x3a   :  { %v64_v24 = vadd.f32 %v62_v22, %v58_v19 }
  0x3b   :  { %v65_v25 = vadd.f32 %v63_v23, %v59_v21 }
  0x3c   :  { %v66_v26 = vsub.f32 0.0, %v64_v24 }
  0x3d   :  { %v67_v27 = vsub.f32 0.0, %v65_v25 }
  0x3f   :  { %v68_v28 = vadd.f32 %v67_v27, %v66_v26 }
  0x41   :  { %69 = vst [vmem:[#allocation7] sm:$0xff] %v68_v28 }
  0x42   :  { %154 = shalt.err (!%p151_p6)
}
  0x43   :  { %s155_s10 = scalar_lea.hbm %s229_s2, 128 }
  0x44   :  { %p156_p7 = scmp.ne.s32.totalorder %s229_s2, %s155_s10  ;;  %p159_p8 = scmp.lt.u32.totalorder %s155_s10, %s229_s2 }
  0x46   :  { %p161_p9 = pnand %p159_p8, %p156_p7 }
  0x48   :  { %164 = shalt.err (!%p161_p9)
}
  0x49   :  { %79 = dma.vmem_to_hbm [thread:$0]  %s77_s6, 128, %s229_s2, [#allocation4]  }
  0x4a   :  { %169 = dma.done.wait [#allocation4], 128  }
  0x4b   :  { %170 = vsyncadd [#allocation4], 4294967168 }
  0x4c   :  { %83 = vsyncpa [#allocation3], 1 }
  0x4d   :  { %84 = vsyncpa [#allocation6], 1 }
  0x4e   :  { %85 = vsyncpa [#allocation4], 1 }

</bundles_post_ra>
